<compile_context>
chip_gen: v7x
topology: tpu7x:2x2x1
jax: 0.10.0
libtpu: 0.0.40
codegen_flags: <defaults>
</compile_context>

<pallas_src>
import jax
import jax.numpy as jnp
from jax.experimental import pallas as pl
from jax.experimental.pallas import tpu as pltpu


def _round_up(n, m):
    return ((n + m - 1) // m) * m


def ensemble_kernel(wts_ref, x_ref, wcat_ref, bcat_ref, o_ref, acc_ref):
    """Grid: (B-tile [parallel], D-tile [arbitrary reduction, last])."""
    d = pl.program_id(1)

    # Zero the resident f32 accumulator on the first D tile.
    @pl.when(d == 0)
    def _():
        acc_ref[...] = jnp.zeros_like(acc_ref)

    # One lane-dense MXU matmul per step: [tb, td](bf16) x [td, M*Kp](bf16)
    # with f32 accumulation.
    acc_ref[...] += jnp.dot(x_ref[...], wcat_ref[...],
                            preferred_element_type=jnp.float32)

    # On the last D tile: weighted sum over ensemble members + bias, then one
    # unmasked lane-dense store of the [tb, Kp] output block.
    @pl.when(d == pl.num_programs(1) - 1)
    def _():
        M, Kp = bcat_ref.shape
        out = jnp.zeros(o_ref.shape, jnp.float32)
        for i in range(M):  # static Python loop over ensemble members
            member = acc_ref[:, i * Kp:(i + 1) * Kp] + bcat_ref[i, :]
            out = out + wts_ref[i] * member
        o_ref[...] = out


def ensemble_forward(x_nchw, wmats, biases, weights, *, tb=8, td=512):
    """x_nchw: [B, C, H, W]; wmats: [M, D, K]; biases: [M, K]; weights: [M]."""
    B = x_nchw.shape[0]
    M, D, K = wmats.shape
    assert x_nchw.size // B == D, "C*H*W must equal D"

    Kp = _round_up(K, 128)          # lane-dense output / MXU N dim
    Bp = _round_up(B, tb)           # sublane-dense rows
    Dp = _round_up(D, td)           # clean reduction tiling

    # Normalized ensemble weights (matches self.weights / self.weights.sum()).
    w_norm = (weights / weights.sum()).astype(jnp.float32)

    # x: NCHW -> [B, D] -> zero-pad -> bf16 stream.
    x2d = x_nchw.reshape(B, D).astype(jnp.float32)
    x2d = jnp.pad(x2d, ((0, Bp - B), (0, Dp - D))).astype(jnp.bfloat16)

    # Member weights: [M, D, K] -> pad D/K -> concat members along lanes
    # -> [Dp, M*Kp], bf16 (streamed from HBM once).
    w_pad = jnp.pad(wmats.astype(jnp.float32),
                    ((0, 0), (0, Dp - D), (0, Kp - K)))
    wcat = jnp.transpose(w_pad, (1, 0, 2)).reshape(Dp, M * Kp)
    wcat = wcat.astype(jnp.bfloat16)

    # Biases: [M, K] -> [M, Kp] f32 (added in f32 at finalize).
    bcat = jnp.pad(biases.astype(jnp.float32), ((0, 0), (0, Kp - K)))

    grid = (Bp // tb, Dp // td)

    out_padded = pl.pallas_call(
        ensemble_kernel,
        out_shape=jax.ShapeDtypeStruct((Bp, Kp), jnp.float32),
        grid=grid,
        in_specs=[
            # normalized ensemble weights: scalars in SMEM
            pl.BlockSpec(memory_space=pltpu.MemorySpace.SMEM),
            # x tile: [tb, td]
            pl.BlockSpec((tb, td), lambda b, d: (b, d)),
            # concatenated member weights tile: [td, M*Kp]
            pl.BlockSpec((td, M * Kp), lambda b, d: (d, 0)),
            # all member biases (resident, same block every step)
            pl.BlockSpec((M, Kp), lambda b, d: (0, 0)),
        ],
        # same output block across the D axis -> resident, written once at end
        out_specs=pl.BlockSpec((tb, Kp), lambda b, d: (b, 0)),
        scratch_shapes=[pltpu.VMEM((tb, M * Kp), jnp.float32)],
        compiler_params=pltpu.CompilerParams(
            dimension_semantics=("parallel", "arbitrary"),
            vmem_limit_bytes=32 * 1024 * 1024),
    )(w_norm, x2d, wcat, bcat)

    return out_padded[:B, :K]


if __name__ == "__main__":
    # Small, deterministic shapes consistent with an image-classifier ensemble.
    B, C, H, W = 2, 4, 16, 16          # NCHW input
    D = C * H * W                      # flattened feature dim = 1024
    K = 10                             # num classes
    M = 2                              # two ensemble members (CNN + ResNet stand-ins)

    key = jax.random.PRNGKey(0)
    kx, kw, kb = jax.random.split(key, 3)

    x = jax.random.normal(kx, (B, C, H, W), dtype=jnp.float32)
    wmats = jax.random.normal(kw, (M, D, K), dtype=jnp.float32) * 0.02
    biases = jax.random.normal(kb, (M, K), dtype=jnp.float32) * 0.1
    weights = jnp.array([1.0, 3.0], dtype=jnp.float32)   # un-normalized ensemble weights

    out = ensemble_forward(x, wmats, biases, weights)
    out = jax.block_until_ready(out)

    # Pure-JAX reference at the kernel's precision (bf16 operands, f32 accum):
    #   sum_i w_i * (x @ W_i + b_i), w normalized.
    w_norm = weights / weights.sum()
    x2d_ref = x.reshape(B, D).astype(jnp.bfloat16)
    ref = jnp.zeros((B, K), jnp.float32)
    for i in range(M):
        yi = jnp.dot(x2d_ref, wmats[i].astype(jnp.bfloat16),
                     preferred_element_type=jnp.float32) + biases[i]
        ref = ref + w_norm[i] * yi

    assert out.shape == (B, K) and out.dtype == jnp.float32
    assert jnp.allclose(out, ref, atol=2e-3, rtol=2e-3), "mismatch vs reference"
    print("KERNEL_OK")
</pallas_src>

<mosaic_0001>
module attributes {stable_mosaic.version = 11 : i64} {
  func.func @ensemble_kernel(%arg0: i32, %arg1: i32, %arg2: memref<2xf32, #tpu.memory_space<smem>>, %arg3: memref<8x512xbf16, #tpu.memory_space<vmem>>, %arg4: memref<512x256xbf16, #tpu.memory_space<vmem>>, %arg5: memref<2x128xf32, #tpu.memory_space<vmem>>, %arg6: memref<8x128xf32, #tpu.memory_space<vmem>>, %arg7: memref<8x256xf32, #tpu.memory_space<vmem>>) attributes {dimension_semantics = [#tpu.dimension_semantics<parallel>, #tpu.dimension_semantics<arbitrary>], iteration_bounds = array<i64: 1, 2>, scalar_prefetch = 0 : i64, scratch_operands = 1 : i64, tpu.core_type = #tpu.core_type<tc>, window_params = [{transform_indices = @transform_0, window_bounds = array<i64: 2>}, {transform_indices = @transform_1, window_bounds = array<i64: 8, 512>}, {transform_indices = @transform_2, window_bounds = array<i64: 512, 256>}, {pipeline_mode = #tpu.pipeline_mode<synchronous>, transform_indices = @transform_3, window_bounds = array<i64: 2, 128>}, {transform_indices = @transform_4, window_bounds = array<i64: 8, 128>}]} {
    %c0_i32 = arith.constant 0 : i32
    %0 = arith.cmpi eq, %arg1, %c0_i32 : i32
    %1 = arith.extui %0 : i1 to i32
    %c0_i32_0 = arith.constant 0 : i32
    %2 = arith.cmpi ne, %1, %c0_i32_0 : i32
    scf.if %2 {
      %cst_9 = arith.constant 0.000000e+00 : f32
      %12 = vector.broadcast %cst_9 : f32 to vector<8x256xf32>
      %c0_10 = arith.constant 0 : index
      %c0_11 = arith.constant 0 : index
      %13 = vector.load %arg7[%c0_10, %c0_11] : memref<8x256xf32, #tpu.memory_space<vmem>>, vector<8x256xf32>
      tpu.vector_store %arg7[%c0_10, %c0_11], %12 {strides = array<i32>} : memref<8x256xf32, #tpu.memory_space<vmem>>, vector<8x256xf32>,
    } else {
    }
    %c0 = arith.constant 0 : index
    %c0_1 = arith.constant 0 : index
    %3 = vector.load %arg7[%c0, %c0_1] : memref<8x256xf32, #tpu.memory_space<vmem>>, vector<8x256xf32>
    %c0_2 = arith.constant 0 : index
    %c0_3 = arith.constant 0 : index
    %4 = vector.load %arg3[%c0_2, %c0_3] : memref<8x512xbf16, #tpu.memory_space<vmem>>, vector<8x512xbf16>
    %c0_4 = arith.constant 0 : index
    %c0_5 = arith.constant 0 : index
    %5 = vector.load %arg4[%c0_4, %c0_5] : memref<512x256xbf16, #tpu.memory_space<vmem>>, vector<512x256xbf16>
    %cst = arith.constant dense<0.000000e+00> : vector<8x256xf32>
    %6 = tpu.matmul %4, %5, %cst {dimension_numbers = #tpu.dot_dimension_numbers<[1], [0], [0], [1], [0, 0, 1, 1], [], []>} : vector<8x512xbf16>, vector<512x256xbf16>, vector<8x256xf32> -> vector<8x256xf32>
    %7 = arith.addf %3, %6 : vector<8x256xf32>
    %c0_6 = arith.constant 0 : index
    %c0_7 = arith.constant 0 : index
    %8 = vector.load %arg7[%c0_6, %c0_7] : memref<8x256xf32, #tpu.memory_space<vmem>>, vector<8x256xf32>
    tpu.vector_store %arg7[%c0_6, %c0_7], %7 {strides = array<i32>} : memref<8x256xf32, #tpu.memory_space<vmem>>, vector<8x256xf32>,
    %c1_i32 = arith.constant 1 : i32
    %9 = arith.cmpi eq, %arg1, %c1_i32 : i32
    %10 = arith.extui %9 : i1 to i32
    %c0_i32_8 = arith.constant 0 : i32
    %11 = arith.cmpi ne, %10, %c0_i32_8 : i32
    scf.if %11 {
      %cst_9 = arith.constant 0.000000e+00 : f32
      %12 = vector.broadcast %cst_9 : f32 to vector<8x128xf32>
      %c0_10 = arith.constant 0 : index
      %c0_11 = arith.constant 0 : index
      %13 = vector.load %arg7[%c0_10, %c0_11] : memref<8x256xf32, #tpu.memory_space<vmem>>, vector<8x128xf32>
      %c0_12 = arith.constant 0 : index
      %c0_13 = arith.constant 0 : index
      %14 = vector.load %arg5[%c0_12, %c0_13] : memref<2x128xf32, #tpu.memory_space<vmem>>, vector<1x128xf32>
      %15 = vector.shape_cast %14 : vector<1x128xf32> to vector<128xf32>
      %16 = vector.shape_cast %15 : vector<128xf32> to vector<1x128xf32>
      %17 = vector.broadcast %16 : vector<1x128xf32> to vector<8x128xf32>
      %18 = arith.addf %13, %17 : vector<8x128xf32>
      %c0_14 = arith.constant 0 : index
      %19 = memref.load %arg2[%c0_14] : memref<2xf32, #tpu.memory_space<smem>>
      %20 = vector.broadcast %19 : f32 to vector<8x128xf32>
      %21 = arith.mulf %20, %18 : vector<8x128xf32>
      %22 = arith.addf %12, %21 : vector<8x128xf32>
      %c0_15 = arith.constant 0 : index
      %c128 = arith.constant 128 : index
      %23 = vector.load %arg7[%c0_15, %c128] : memref<8x256xf32, #tpu.memory_space<vmem>>, vector<8x128xf32>
      %c1 = arith.constant 1 : index
      %c0_16 = arith.constant 0 : index
      %24 = vector.load %arg5[%c1, %c0_16] : memref<2x128xf32, #tpu.memory_space<vmem>>, vector<1x128xf32>
      %25 = vector.shape_cast %24 : vector<1x128xf32> to vector<128xf32>
      %26 = vector.shape_cast %25 : vector<128xf32> to vector<1x128xf32>
      %27 = vector.broadcast %26 : vector<1x128xf32> to vector<8x128xf32>
      %28 = arith.addf %23, %27 : vector<8x128xf32>
      %c1_17 = arith.constant 1 : index
      %29 = memref.load %arg2[%c1_17] : memref<2xf32, #tpu.memory_space<smem>>
      %30 = vector.broadcast %29 : f32 to vector<8x128xf32>
      %31 = arith.mulf %30, %28 : vector<8x128xf32>
      %32 = arith.addf %22, %31 : vector<8x128xf32>
      %c0_18 = arith.constant 0 : index
      %c0_19 = arith.constant 0 : index
      %33 = vector.load %arg6[%c0_18, %c0_19] : memref<8x128xf32, #tpu.memory_space<vmem>>, vector<8x128xf32>
      tpu.vector_store %arg6[%c0_18, %c0_19], %32 {strides = array<i32>} : memref<8x128xf32, #tpu.memory_space<vmem>>, vector<8x128xf32>,
    } else {
    }
    return
  }
  func.func @transform_0(%arg0: i32, %arg1: i32) -> i32 {
    %c0_i32 = arith.constant 0 : i32
    %c0_i32_0 = arith.constant 0 : i32
    return %c0_i32 : i32
  }
  func.func @transform_1(%arg0: i32, %arg1: i32) -> (i32, i32) {
    %c0_i32 = arith.constant 0 : i32
    return %arg0, %arg1 : i32, i32
  }
  func.func @transform_2(%arg0: i32, %arg1: i32) -> (i32, i32) {
    %c0_i32 = arith.constant 0 : i32
    %c0_i32_0 = arith.constant 0 : i32
    return %arg1, %c0_i32 : i32, i32
  }
  func.func @transform_3(%arg0: i32, %arg1: i32) -> (i32, i32) {
    %c0_i32 = arith.constant 0 : i32
    %c0_i32_0 = arith.constant 0 : i32
    %c0_i32_1 = arith.constant 0 : i32
    return %c0_i32, %c0_i32_0 : i32, i32
  }
  func.func @transform_4(%arg0: i32, %arg1: i32) -> (i32, i32) {
    %c0_i32 = arith.constant 0 : i32
    %c0_i32_0 = arith.constant 0 : i32
    return %arg0, %c0_i32 : i32, i32
  }
}

</mosaic_0001>

<bundles_post_ra>
// kernel: tpu_custom_call.1
= control target key start
LH: loop header
LB: loop body
LE: loop exit
PB: predicated region body
PF: predicated region fallthrough
CT: control target
= control target key end

     0   :  { %9 = vsyncpa [#allocation6], 0  ;;  %s1681_s0 = inlined_call_operand.hbm [shape: f32[2], index: 0, kind: input, shape index: {}]   ;;  %s1682_s1 = inlined_call_operand.hbm [shape: bf16[8,1024], index: 1, kind: input, shape index: {}]   ;;  %s1683_s2 = inlined_call_operand.hbm [shape: bf16[1024,256], index: 2, kind: input, shape index: {}]   ;;  %s1684_s3 = inlined_call_operand.vmem [shape: f32[2,128], index: 3, kind: input, shape index: {}]   ;;  %s1685_s4 = inlined_call_operand.hbm [shape: f32[8,128], index: 4, kind: output, shape index: {}]  }
   0x1   :  { %10 = vsyncpa [#allocation4], 0 }
   0x2   :  { %12 = vsyncpa [#allocation4 + $0x1], 0 }
   0x3   :  { %13 = vsyncpa [#allocation9], 0 }
   0x4   :  { %15 = vsyncpa [#allocation9 + $0x1], 0 }
   0x5   :  { %16 = vsyncpa [#allocation5], 0  ;;  %s1378_s15 = smov 0   ;;  %s1380_s16 = smov 0  }
   0x6   :  { %s1382_s17 = smov 0   ;;  %s1384_s18 = smov 0  }
   0x7   :  { %s1386_s19 = smov 0   ;;  %s1388_s20 = smov 0  }
   0x8 LB: > { %s907_s21 = sadd.s32 4294967295, %s1344_s20   ;;  %s64_s22 = sadd.s32 1, %s1332_s17  ;;  %s1344_s20 = sphi %s1388_s20, %s22_s20   ;;  %s1340_s19 = sphi %s1386_s19, %s1701_s19   ;;  %s1336_s18 = sphi %s1384_s18, %s1700_s18   ;;  %s1332_s17 = sphi %s1382_s17, %s1699_s17   ;;  %s1328_s16 = sphi %s1380_s16, %s1698_s16   ;;  %s1324_s15 = sphi %s1378_s15, %s1697_s15  }
   0x9   : > { %p71_p0 = scmp.ne.s32.totalorder %s1332_s17, %s1328_s16  ;;  %p77_p1 = scmp.ne.s32.totalorder %s1328_s16, %s1324_s15 }
   0xa   : > { %p1413_p2 = scmp.eq.s32.totalorder %s907_s21, 0  ;;  %p908_p3 = scmp.ge.s32.totalorder %s1344_s20, 1 }
   0xb   : > { %p161_p4 = scmp.lt.s32.totalorder %s1344_s20, 3  ;;  %p72_p7 = scmp.eq.s32.totalorder %s1344_s20, 0 }
   0xc   : > { %s1689_s23 = scalar_select %p1413_p2, 1, 0 }
   0xd   : > { %p1421_p5 = por %p1413_p2, %p77_p1  ;;  %p1425_p6 = pnand %p908_p3, %p161_p4 }
   0xe   : > { %s31_s26 = sadd.s32 1, %s1340_s19  ;;  %p1433_p9 = por %p72_p7, %p71_p0 }
   0xf   : > { %s1690_s24 = scalar_select %p1421_p5, 1, 0 }
  0x10   : > { %p1014_p8 = pneg %p1425_p6  ;;  %p32_p11 = scmp.ge.s32.totalorder %s31_s26, 2 }
  0x11   : > { %p1026_p12 = scmp.lt.s32.totalorder %s1344_s20, 2  ;;  %s1441_s28 = sand.u32 1, %s1332_s17  }
  0x12   : > { %p1015_p10 = pnand %p1014_p8, %p1413_p2  ;;  %s1183_s5 = scalar_lea.hbm %s1681_s0, 16 }
  0x13   : > { %p1184_p13 = scmp.ne.s32.totalorder %s1681_s0, %s1183_s5  ;;  %p1190_p4 = scmp.lt.u32.totalorder %s1183_s5, %s1681_s0 }
  0x14   : > { %p1185_p1 = pneg %p1015_p10 }
  0x16   : > { %p1186_p3 = pnand %p1185_p1, %p1184_p13 }
  0x18   : > { %p1187_p0 = pneg %p1186_p3 }
  0x1a   : > { %p1192_p7 = pnand %p1190_p4, %p1187_p0 }
  0x1c   : > { %1195 = shalt.err (!%p1192_p7)
}
  0x1d   : > { %s1346_s10 = smov [#allocation3]   ;;  %s1703_s26 = smov (%p32_p11, %s31_s26), 0 }
  0x1e   : > { %1017 = dma.hbm_to_smem (!%p1015_p10), %s1681_s0, 16, %s1346_s10, [#allocation6]  }
  0x1f   : > { %s911_s13 = sshll.u32 %s1441_s28, 4  ;;  %s999_s14 = sshll.u32 %s1340_s19, 8 }
  0x20   : > { %s60_s15 = ssub.s32 %s1340_s19, %s1703_s26  ;;  %s1464_s5 = scalar_lea.hbm %s1682_s1, %s999_s14 }
  0x21   : > { %p62_p8 = scmp.eq.s32.totalorder %s60_s15, 0  ;;  %s190_s6 = scalar_lea.vmem [#allocation7], %s911_s13 }
  0x22   : > { %s200_s7 = sshll.u32 %s190_s6, 4  ;;  %p1470_p10 = pnand %p1026_p12, %p1433_p9  ;;  %s1479_s7 = int_to_ptr.vmem [resolvable:$true] %s200_s7 }
  0x23   : > { %s1477_s9 = scalar_select %p62_p8, %s1332_s17, %s64_s22  }
  0x24   : > { %s187_s10 = scalar_lea.sflag [#allocation4], %s1441_s28  ;;  %s1196_s11 = scalar_lea.hbm %s1464_s5, 256 }
  0x25   : > { %p1197_p11 = scmp.ne.s32.totalorder %s1464_s5, %s1196_s11  ;;  %p1198_p13 = pneg %p1470_p10 }
  0x26   : > { %s1201_s13 = scalar_lea.hbm %s1682_s1, 512  ;;  %p1202_p9 = scmp.lt.u32.totalorder %s1464_s5, %s1682_s1 }
  0x27   : > { %p1199_p1 = pnand %p1198_p13, %p1197_p11  ;;  %p1203_p12 = scmp.lt.u32.totalorder %s1201_s13, %s1196_s11 }
  0x28   : > { %p1205_p4 = scmp.lt.u32.totalorder %s1196_s11, %s1464_s5 }
  0x29   : > { %p1200_p3 = pneg %p1199_p1  ;;  %p1204_p0 = por %p1203_p12, %p1202_p9 }
  0x2b   : > { %p1206_p7 = por %p1205_p4, %p1204_p0 }
  0x2d   : > { %p1207_p8 = pnand %p1206_p7, %p1200_p3 }
  0x2f   : > { %1210 = shalt.err (!%p1207_p8)
}
  0x30   : > { %s1211_s22 = scalar_lea.vmem %s1479_s7, 256  ;;  %s1347_s29 = smov [#allocation7]  }
  0x31   : > { %p1212_p11 = scmp.ne.s32.totalorder %s1479_s7, %s1211_s22  ;;  %s1216_s30 = sshll.u32 %s1347_s29, 4  ;;  %s1217_s30 = int_to_ptr.vmem [resolvable:$false] %s1216_s30 }
  0x32   : > { %s1218_s6 = scalar_lea.vmem %s1217_s30, 512  ;;  %p1219_p2 = scmp.lt.s32.totalorder %s1479_s7, %s1217_s30 }
  0x33   : > { %p1214_p1 = pnand %p1212_p11, %p1198_p13  ;;  %p1220_p9 = scmp.lt.s32.totalorder %s1218_s6, %s1211_s22 }
  0x35   : > { %p1215_p5 = pneg %p1214_p1  ;;  %p1221_p12 = por %p1220_p9, %p1219_p2 }
  0x37   : > { %p1222_p0 = pnand %p1221_p12, %p1215_p5 }
  0x39   : > { %1225 = shalt.err (!%p1222_p0)
}
  0x3a   : > { %1021 = dma.hbm_to_vmem [thread:$0]  (!%p1470_p10), %s1464_s5, 256, %s1479_s7, %s187_s10  }
  0x3b   : > { %s914_s11 = sshll.u32 %s1441_s28, 9  ;;  %s1001_s27 = sshll.u32 %s1340_s19, 13 }
  0x3c   : > { %s1512_s14 = scalar_lea.hbm %s1683_s2, %s1001_s27  ;;  %s211_s15 = scalar_lea.vmem [#allocation8], %s914_s11 }
  0x3d   : > { %s219_s22 = sshll.u32 %s211_s15, 4  ;;  %s208_s29 = scalar_lea.sflag [#allocation9], %s1441_s28  ;;  %s1514_s22 = int_to_ptr.vmem [resolvable:$true] %s219_s22 }
  0x3e   : > { %s1226_s30 = scalar_lea.hbm %s1512_s14, 8192  ;;  %s1231_s10 = scalar_lea.hbm %s1683_s2, 16384 }
  0x3f   : > { %p1227_p2 = scmp.ne.s32.totalorder %s1512_s14, %s1226_s30  ;;  %p1232_p4 = scmp.lt.u32.totalorder %s1512_s14, %s1683_s2 }
  0x40   : > { %p1233_p7 = scmp.lt.u32.totalorder %s1231_s10, %s1226_s30  ;;  %p1235_p11 = scmp.lt.u32.totalorder %s1226_s30, %s1512_s14 }
  0x41   : > { %p1229_p5 = pnand %p1227_p2, %p1198_p13 }
  0x42   : > { %p1234_p8 = por %p1233_p7, %p1232_p4 }
  0x43   : > { %p1230_p3 = pneg %p1229_p5 }
  0x44   : > { %p1236_p1 = por %p1235_p11, %p1234_p8 }
  0x46   : > { %p1237_p9 = pnand %p1236_p1, %p1230_p3 }
  0x48   : > { %1240 = shalt.err (!%p1237_p9)
}
  0x49   : > { %s1241_s11 = scalar_lea.vmem %s1514_s22, 8192  ;;  %s1348_s12 = smov [#allocation8]  }
  0x4a   : > { %p1242_p12 = scmp.ne.s32.totalorder %s1514_s22, %s1241_s11  ;;  %s1246_s13 = sshll.u32 %s1348_s12, 4  ;;  %s1247_s13 = int_to_ptr.vmem [resolvable:$false] %s1246_s13 }
  0x4b   : > { %s1248_s15 = scalar_lea.vmem %s1247_s13, 16384  ;;  %p1249_p5 = scmp.lt.s32.totalorder %s1514_s22, %s1247_s13 }
  0x4c   : > { %p1244_p0 = pnand %p1242_p12, %p1198_p13  ;;  %p1250_p4 = scmp.lt.s32.totalorder %s1248_s15, %s1241_s11 }
  0x4e   : > { %p1245_p2 = pneg %p1244_p0  ;;  %p1251_p7 = por %p1250_p4, %p1249_p5 }
  0x50   : > { %p1252_p8 = pnand %p1251_p7, %p1245_p2 }
  0x52   : > { %1255 = shalt.err (!%p1252_p8)
}
  0x53   : > { %s1349_s30 = smov 128   ;;  %s1350_s5 = smov 8  }
  0x54   : > { %1024 = dma.hbm_to_vmem [thread:$0]  (!%p1470_p10), %s1512_s14, 8192, %s1514_s22, %s208_s29, %s1349_s30, %s1349_s30, %s1350_s5  }
  0x55   : > { %231 = sbr.rel (%p1425_p6) target bundleno = 434 (0x1b2), region = 36  ;;  %p1694_p13 = scmp.ne.s32.totalorder (!%p1425_p6), %s1689_s23, 0 }
  0x5c   : > { %1307 = dma.done.wait (%p1694_p13), [#allocation6], 16  }
  0x5d   : > { %1309 = vsyncadd (%p1694_p13), [#allocation6], 4294967280  ;;  %s237_s7 = sand.u32 1, %s1328_s16   ;;  %p1695_p3 = scmp.ne.s32.totalorder %s1690_s24, 0 }
  0x5e   : > { %s920_s10 = sshll.u32 %s237_s7, 4  ;;  %s238_s6 = scalar_lea.sflag [#allocation4], %s237_s7 }
  0x5f   : > { %s1549_s27 = scalar_lea.vmem [#allocation7], %s920_s10 }
  0x60   : > { %1311 = dma.done.wait (%p1695_p3), %s238_s6, 256  }
  0x61   : > { %1313 = vsyncadd (%p1695_p3), %s238_s6, 4294967040  ;;  %s921_s25 = sshll.u32 %s237_s7, 9  ;;  %s247_s28 = scalar_lea.sflag [#allocation9], %s237_s7 }
  0x62   : > { %s1555_s8 = scalar_lea.vmem [#allocation8], %s921_s25 }
  0x63   : > { %1315 = dma.done.wait (%p1695_p3), %s247_s28, 8192  }
  0x64   : > { %1317 = vsyncadd (%p1695_p3), %s247_s28, 4294959104 }
  0x65   : > { %255 = sfence }
  0x66   : > { %p922_p6 = scmp.ne.s32.totalorder %s1336_s18, 0 }
  0x67   : > { %v1351_v0 = vmov (!%p922_p6), 0.0  }
  0x68   : > { %281 = sbr.rel (%p922_p6) target bundleno = 111 (0x6f), region = 52  ;;  %282 = vst [vmem:[#allocation2] sm:$0xff] (!%p922_p6), %v1351_v0  ;;  %283 = vst [vmem:[#allocation2 + $0x8] sm:$0xff] (!%p922_p6), %v1351_v0 }
  0x6f PF: > { %v1083_v1 = vld [vmem:[%s1555_s8 + $0x4] ss:$8 sps:$4 sm:$0xff]   ;;  %v1087_v3 = vld [vmem:[%s1555_s8] ss:$8 sps:$4 sm:$0xff]   ;;  %v1089_v5 = vld [vmem:[%s1555_s8 + $0x14] ss:$8 sps:$4 sm:$0xff]  }
  0x70   : > { %v1085_v2 = vld [vmem:[%s1555_s8 + $0x104] ss:$8 sps:$4 sm:$0xff]   ;;  %686 = vmatprep.subr.bf16.mxu0 %v1083_v1  ;;  %v1088_v4 = vld [vmem:[%s1555_s8 + $0x100] ss:$8 sps:$4 sm:$0xff]   ;;  %v1091_v6 = vld [vmem:[%s1555_s8 + $0x114] ss:$8 sps:$4 sm:$0xff]  }
  0x71   : > { %727 = vmatprep.subr.bf16.mxu1 %v1085_v2  ;;  %687 = vmatpush1.bf16.msra.mxu0 %v1087_v3  ;;  %v1093_v7 = vld [vmem:[%s1555_s8 + $0x10] ss:$8 sps:$4 sm:$0xff]   ;;  %v1095_v9 = vld [vmem:[%s1555_s8 + $0x24] ss:$8 sps:$4 sm:$0xff]   ;;  %v1099_v11 = vld [vmem:[%s1555_s8 + $0x20] ss:$8 sps:$4 sm:$0xff]  }
  0x72   : > { %728 = vmatpush1.bf16.msra.mxu1 %v1088_v4  ;;  %688 = vmatprep.subr.bf16.mxu0 %v1089_v5  ;;  %v1094_v8 = vld [vmem:[%s1555_s8 + $0x110] ss:$8 sps:$4 sm:$0xff]   ;;  %v1097_v10 = vld [vmem:[%s1555_s8 + $0x124] ss:$8 sps:$4 sm:$0xff]   ;;  %v1100_v12 = vld [vmem:[%s1555_s8 + $0x120] ss:$8 sps:$4 sm:$0xff]  }
  0x73   : > { %729 = vmatprep.subr.bf16.mxu1 %v1091_v6  ;;  %v1101_v13 = vld [vmem:[%s1555_s8 + $0x34] ss:$8 sps:$4 sm:$0xff]   ;;  %v1105_v15 = vld [vmem:[%s1555_s8 + $0x30] ss:$8 sps:$4 sm:$0xff]   ;;  %v1107_v17 = vld [vmem:[%s1555_s8 + $0x44] ss:$8 sps:$4 sm:$0xff]  }
  0x74   : > { %v1103_v14 = vld [vmem:[%s1555_s8 + $0x134] ss:$8 sps:$4 sm:$0xff]   ;;  %v1106_v16 = vld [vmem:[%s1555_s8 + $0x130] ss:$8 sps:$4 sm:$0xff]   ;;  %v1109_v18 = vld [vmem:[%s1555_s8 + $0x144] ss:$8 sps:$4 sm:$0xff]  }
  0x75   : > { %689 = vmatpush1.bf16.msra.mxu0 %v1093_v7  ;;  %v1111_v19 = vld [vmem:[%s1555_s8 + $0x40] ss:$8 sps:$4 sm:$0xff]   ;;  %v1113_v21 = vld [vmem:[%s1555_s8 + $0x54] ss:$8 sps:$4 sm:$0xff]   ;;  %v1117_v23 = vld [vmem:[%s1555_s8 + $0x50] ss:$8 sps:$4 sm:$0xff]  }
  0x76   : > { %730 = vmatpush1.bf16.msra.mxu1 %v1094_v8  ;;  %690 = vmatprep.subr.bf16.mxu0 %v1095_v9  ;;  %v1112_v20 = vld [vmem:[%s1555_s8 + $0x140] ss:$8 sps:$4 sm:$0xff]   ;;  %v1115_v22 = vld [vmem:[%s1555_s8 + $0x154] ss:$8 sps:$4 sm:$0xff]   ;;  %v1118_v24 = vld [vmem:[%s1555_s8 + $0x150] ss:$8 sps:$4 sm:$0xff]  }
  0x77   : > { %731 = vmatprep.subr.bf16.mxu1 %v1097_v10  ;;  %v1119_v25 = vld [vmem:[%s1555_s8 + $0x64] ss:$8 sps:$4 sm:$0xff]   ;;  %v1123_v27 = vld [vmem:[%s1555_s8 + $0x60] ss:$8 sps:$4 sm:$0xff]   ;;  %v1125_v29 = vld [vmem:[%s1555_s8 + $0x74] ss:$8 sps:$4 sm:$0xff]  }
  0x78   : > { %v1121_v26 = vld [vmem:[%s1555_s8 + $0x164] ss:$8 sps:$4 sm:$0xff]   ;;  %v1124_v28 = vld [vmem:[%s1555_s8 + $0x160] ss:$8 sps:$4 sm:$0xff]   ;;  %v1127_v30 = vld [vmem:[%s1555_s8 + $0x174] ss:$8 sps:$4 sm:$0xff]  }
  0x79   : > { %691 = vmatpush1.bf16.msra.mxu0 %v1099_v11  ;;  %v1129_v31 = vld [vmem:[%s1555_s8 + $0x70] ss:$8 sps:$4 sm:$0xff]   ;;  %v1131_v33 = vld [vmem:[%s1555_s8 + $0x84] ss:$8 sps:$4 sm:$0xff]   ;;  %v1135_v35 = vld [vmem:[%s1555_s8 + $0x80] ss:$8 sps:$4 sm:$0xff]  }
  0x7a   : > { %732 = vmatpush1.bf16.msra.mxu1 %v1100_v12  ;;  %692 = vmatprep.subr.bf16.mxu0 %v1101_v13  ;;  %v1130_v32 = vld [vmem:[%s1555_s8 + $0x170] ss:$8 sps:$4 sm:$0xff]   ;;  %v1133_v34 = vld [vmem:[%s1555_s8 + $0x184] ss:$8 sps:$4 sm:$0xff]   ;;  %v1136_v36 = vld [vmem:[%s1555_s8 + $0x180] ss:$8 sps:$4 sm:$0xff]  }
  0x7b   : > { %733 = vmatprep.subr.bf16.mxu1 %v1103_v14  ;;  %v1137_v37 = vld [vmem:[%s1555_s8 + $0x94] ss:$8 sps:$4 sm:$0xff]   ;;  %v1141_v39 = vld [vmem:[%s1555_s8 + $0x90] ss:$8 sps:$4 sm:$0xff]   ;;  %v1143_v41 = vld [vmem:[%s1555_s8 + $0xa4] ss:$8 sps:$4 sm:$0xff]  }
  0x7c   : > { %v1139_v38 = vld [vmem:[%s1555_s8 + $0x194] ss:$8 sps:$4 sm:$0xff]   ;;  %v1142_v40 = vld [vmem:[%s1555_s8 + $0x190] ss:$8 sps:$4 sm:$0xff]   ;;  %v1145_v42 = vld [vmem:[%s1555_s8 + $0x1a4] ss:$8 sps:$4 sm:$0xff]  }
  0x7d   : > { %693 = vmatpush1.bf16.msra.mxu0 %v1105_v15  ;;  %v1147_v43 = vld [vmem:[%s1555_s8 + $0xa0] ss:$8 sps:$4 sm:$0xff]   ;;  %v1149_v45 = vld [vmem:[%s1555_s8 + $0xb4] ss:$8 sps:$4 sm:$0xff]   ;;  %v1153_v50 = vld [vmem:[%s1555_s8 + $0xb0] ss:$8 sps:$4 sm:$0xff]  }
  0x7e   : > { %734 = vmatpush1.bf16.msra.mxu1 %v1106_v16  ;;  %694 = vmatprep.subr.bf16.mxu0 %v1107_v17  ;;  %v1148_v44 = vld [vmem:[%s1555_s8 + $0x1a0] ss:$8 sps:$4 sm:$0xff]   ;;  %v1151_v46 = vld [vmem:[%s1555_s8 + $0x1b4] ss:$8 sps:$4 sm:$0xff]   ;;  %v1154_v51 = vld [vmem:[%s1555_s8 + $0x1b0] ss:$8 sps:$4 sm:$0xff]  }
  0x7f   : > { %735 = vmatprep.subr.bf16.mxu1 %v1109_v18  ;;  %v286_v47 = vld [vmem:[%s1549_s27] sm:$0xff]  ;;  %v287_v49 = vld [vmem:[%s1549_s27 + $0x8] sm:$0xff]  ;;  %p991_p10 = scmp.ne.s32.totalorder %s1336_s18, 1 }
  0x80   : > { %v924_v48 = vcombine.high %v286_v47, %v286_v47  ;;  %v926_v52 = vcombine.high %v287_v49, %v287_v49  ;;  %v1155_v53 = vld [vmem:[%s1555_s8 + $0xc4] ss:$8 sps:$4 sm:$0xff]   ;;  %v1159_v55 = vld [vmem:[%s1555_s8 + $0xc0] ss:$8 sps:$4 sm:$0xff]   ;;  %v1161_v57 = vld [vmem:[%s1555_s8 + $0xd4] ss:$8 sps:$4 sm:$0xff]   ;;  %v923_v5 = vcombine.low %v286_v47, %v286_v47  ;;  %v925_v6 = vcombine.low %v287_v49, %v287_v49 }
  0x81   : > { %695 = vmatpush1.bf16.msra.mxu0 %v1111_v19  ;;  %v1157_v54 = vld [vmem:[%s1555_s8 + $0x1c4] ss:$8 sps:$4 sm:$0xff]   ;;  %v1160_v56 = vld [vmem:[%s1555_s8 + $0x1c0] ss:$8 sps:$4 sm:$0xff]   ;;  %v1163_v58 = vld [vmem:[%s1555_s8 + $0x1d4] ss:$8 sps:$4 sm:$0xff]  }
  0x82   : > { %736 = vmatpush1.bf16.msra.mxu1 %v1112_v20  ;;  %696 = vmatprep.subr.bf16.mxu0 %v1113_v21  ;;  %v1165_v59 = vld [vmem:[%s1555_s8 + $0xd0] ss:$8 sps:$4 sm:$0xff]   ;;  %v1167_v61 = vld [vmem:[%s1555_s8 + $0xe4] ss:$8 sps:$4 sm:$0xff]   ;;  %v1171_v63 = vld [vmem:[%s1555_s8 + $0xe0] ss:$8 sps:$4 sm:$0xff]  }
  0x83   : > { %737 = vmatprep.subr.bf16.mxu1 %v1115_v22  ;;  %718 = vmatprep.mubr.bf16.mxu0 %v924_v48  ;;  %v1166_v60 = vld [vmem:[%s1555_s8 + $0x1d0] ss:$8 sps:$4 sm:$0xff]   ;;  %v1169_v62 = vld [vmem:[%s1555_s8 + $0x1e4] ss:$8 sps:$4 sm:$0xff]   ;;  %v1172_v0 = vld [vmem:[%s1555_s8 + $0x1e0] ss:$8 sps:$4 sm:$0xff]  }
  0x84   : > { %759 = vmatprep.mubr.bf16.mxu1 %v926_v52  ;;  %v1173_v1 = vld [vmem:[%s1555_s8 + $0xf4] ss:$8 sps:$4 sm:$0xff]   ;;  %v1177_v3 = vld [vmem:[%s1555_s8 + $0xf0] ss:$8 sps:$4 sm:$0xff]   ;;  %v992_v22 = vld [vmem:[%s1684_s3] ss:$0 sm:$0xff] (!%p991_p10) }
  0x85   : > { %697 = vmatpush1.bf16.msra.mxu0 %v1117_v23  ;;  %v1175_v2 = vld [vmem:[%s1555_s8 + $0x1f4] ss:$8 sps:$4 sm:$0xff]   ;;  %v1178_v4 = vld [vmem:[%s1555_s8 + $0x1f0] ss:$8 sps:$4 sm:$0xff]   ;;  %s783_s14 = sld [smem:[#allocation3]] (!%p991_p10)  ;;  %s994_s11 = sld [smem:[#allocation3 + $0x1]] (!%p991_p10) }
  0x86   : > { %738 = vmatpush1.bf16.msra.mxu1 %v1118_v24  ;;  %698 = vmatprep.subr.bf16.mxu0 %v1119_v25  ;;  %v284_v8 = vld [vmem:[#allocation2] sm:$0xff]  ;;  %v285_v12 = vld [vmem:[#allocation2 + $0x8] sm:$0xff]  ;;  %v993_v24 = vld [vmem:[%s1684_s3 + $0x1] ss:$0 sm:$0xff] (!%p991_p10) }
  0x87   : > { %739 = vmatprep.subr.bf16.mxu1 %v1121_v26 }
  0x89   : > { %699 = vmatpush1.bf16.msra.mxu0 %v1123_v27 }
  0x8a   : > { %740 = vmatpush1.bf16.msra.mxu1 %v1124_v28  ;;  %700 = vmatprep.subr.bf16.mxu0 %v1125_v29 }
  0x8b   : > { %741 = vmatprep.subr.bf16.mxu1 %v1127_v30  ;;  %v784_v27 = vstv (!%p991_p10), %s783_s14  ;;  %v795_v29 = vstv (!%p991_p10), %s994_s11 }
  0x8d   : > { %701 = vmatpush1.bf16.msra.mxu0 %v1129_v31 }
  0x8e   : > { %742 = vmatpush1.bf16.msra.mxu1 %v1130_v32  ;;  %702 = vmatprep.subr.bf16.mxu0 %v1131_v33 }
  0x8f   : > { %743 = vmatprep.subr.bf16.mxu1 %v1133_v34 }
  0x91   : > { %703 = vmatpush1.bf16.msra.mxu0 %v1135_v35 }
  0x92   : > { %744 = vmatpush1.bf16.msra.mxu1 %v1136_v36  ;;  %704 = vmatprep.subr.bf16.mxu0 %v1137_v37 }
  0x93   : > { %745 = vmatprep.subr.bf16.mxu1 %v1139_v38 }
  0x95   : > { %705 = vmatpush1.bf16.msra.mxu0 %v1141_v39 }
  0x96   : > { %746 = vmatpush1.bf16.msra.mxu1 %v1142_v40  ;;  %706 = vmatprep.subr.bf16.mxu0 %v1143_v41 }
  0x97   : > { %747 = vmatprep.subr.bf16.mxu1 %v1145_v42 }
  0x99   : > { %707 = vmatpush1.bf16.msra.mxu0 %v1147_v43 }
  0x9a   : > { %748 = vmatpush1.bf16.msra.mxu1 %v1148_v44  ;;  %708 = vmatprep.subr.bf16.mxu0 %v1149_v45 }
  0x9b   : > { %749 = vmatprep.subr.bf16.mxu1 %v1151_v46 }
  0x9d   : > { %709 = vmatpush1.bf16.msra.mxu0 %v1153_v50 }
  0x9e   : > { %750 = vmatpush1.bf16.msra.mxu1 %v1154_v51  ;;  %710 = vmatprep.subr.bf16.mxu0 %v1155_v53 }
  0x9f   : > { %751 = vmatprep.subr.bf16.mxu1 %v1157_v54 }
  0xa1   : > { %711 = vmatpush1.bf16.msra.mxu0 %v1159_v55 }
  0xa2   : > { %752 = vmatpush1.bf16.msra.mxu1 %v1160_v56  ;;  %712 = vmatprep.subr.bf16.mxu0 %v1161_v57 }
  0xa3   : > { %753 = vmatprep.subr.bf16.mxu1 %v1163_v58 }
  0xa5   : > { %713 = vmatpush1.bf16.msra.mxu0 %v1165_v59 }
  0xa6   : > { %754 = vmatpush1.bf16.msra.mxu1 %v1166_v60  ;;  %714 = vmatprep.subr.bf16.mxu0 %v1167_v61 }
  0xa7   : > { %755 = vmatprep.subr.bf16.mxu1 %v1169_v62 }
  0xa9   : > { %715 = vmatpush1.bf16.msra.mxu0 %v1171_v63 }
  0xaa   : > { %756 = vmatpush1.bf16.msra.mxu1 %v1172_v0  ;;  %716 = vmatprep.subr.bf16.mxu0 %v1173_v1 }
  0xab   : > { %757 = vmatprep.subr.bf16.mxu1 %v1175_v2 }
  0xad   : > { %717 = vmatpush1.bf16.msra.mxu0 %v1177_v3 }
  0xae   : > { %758 = vmatpush1.bf16.msra.mxu1 %v1178_v4 }
  0xb0   : > { %719 = vmatmul.mubr.bf16.vlgmr.msra.gmra.mrb[0].mxu0 %v923_v5 }
  0xb1   : > { %760 = vmatmul.mubr.bf16.vlgmr.msra.gmra.mrb[0].mxu1 %v925_v6 }
 0x183   : > { %v720_v7 = vpop.f32.mrb[0].mxu0 }
 0x184   : > { %v761_v9 = vpop.f32.mrb[0].mxu1  ;;  %v722_v11 = vpop.f32.mrb[1].mxu0  ;;  %775 = sbr.rel (%p991_p10) target bundleno = 409 (0x199), region = 56 }
 0x185   : > { %v762_v10 = vadd.f32 %v761_v9, %v720_v7  ;;  %v763_v13 = vpop.f32.mrb[1].mxu1  ;;  %v724_v15 = vpop.f32.mrb[2].mxu0 }
 0x186   : > { %v764_v14 = vadd.f32 %v763_v13, %v722_v11  ;;  %v765_v16 = vpop.f32.mrb[2].mxu1  ;;  %v725_v18 = vpop.f32.mrb[3].mxu0 }
 0x187   : > { %v768_v17 = vadd.f32 %v762_v10, %v284_v8  ;;  %v766_v19 = vpop.f32.mrb[3].mxu1 }
 0x188   : > { %v769_v20 = vadd.f32 %v764_v14, %v285_v12 }
 0x189   : > { %770 = vst [vmem:[#allocation2] sm:$0xff] %v768_v17 }
 0x18a   : > { %771 = vst [vmem:[#allocation2 + $0x8] sm:$0xff] %v769_v20 }
 0x190   : > { %v776_v21 = vld [vmem:[#allocation2] sm:$0xff] }
 0x191   : > { %v787_v23 = vld [vmem:[#allocation2 + $0x8] sm:$0xff]  ;;  %v782_v25 = vadd.f32 %v992_v22, %v776_v21 }
 0x192   : > { %v793_v26 = vadd.f32 %v993_v24, %v787_v23 }
 0x193   : > { %v785_v28 = vmul.f32 %v784_v27, %v782_v25 }
 0x194   : > { %v796_v30 = vmul.f32 %v795_v29, %v793_v26 }
 0x196   : > { %v797_v31 = vadd.f32 %v796_v30, %v785_v28 }
 0x198   : > { %798 = vst [vmem:[#allocation10] sm:$0xff] %v797_v31 }
 0x199 PF: > { %p1637_p11 = scmp.eq.s32.totalorder %s907_s21, 1  ;;  %s1352_s12 = smov [#allocation10]  }
 0x19a   : > { %s808_s13 = sshll.u32 %s1352_s12, 4  ;;  %s809_s13 = int_to_ptr.vmem [resolvable:$true] %s808_s13 }
 0x19b   : > { %s1256_s15 = scalar_lea.vmem %s809_s13, 128  ;;  %p1263_p0 = scmp.lt.s32.totalorder %s809_s13, %s809_s13 }
 0x19c   : > { %p1257_p1 = scmp.ne.s32.totalorder %s809_s13, %s1256_s15  ;;  %p1264_p2 = scmp.lt.s32.totalorder %s1256_s15, %s1256_s15 }
 0x19e   : > { %p1258_p9 = pnand %p1257_p1, %p1637_p11  ;;  %p1265_p5 = por %p1264_p2, %p1263_p0 }
 0x1a0   : > { %p1259_p12 = pneg %p1258_p9 }
 0x1a2   : > { %p1266_p4 = pnand %p1265_p5, %p1259_p12 }
 0x1a4   : > { %1269 = shalt.err (!%p1266_p4)
}
 0x1a5   : > { %s1270_s21 = scalar_lea.hbm %s1685_s4, 128 }
 0x1a6   : > { %p1271_p7 = scmp.ne.s32.totalorder %s1685_s4, %s1270_s21  ;;  %p1276_p3 = scmp.lt.u32.totalorder %s1270_s21, %s1685_s4 }
 0x1a8   : > { %p1272_p8 = pnand %p1271_p7, %p1637_p11 }
 0x1aa   : > { %p1273_p13 = pneg %p1272_p8 }
 0x1ac   : > { %p1278_p6 = pnand %p1276_p3, %p1273_p13 }
 0x1ae   : > { %1281 = shalt.err (!%p1278_p6)
}
 0x1af   : > { %1011 = dma.vmem_to_hbm [thread:$0]  (%p1637_p11), %s809_s13, 128, %s1685_s4, [#allocation5]  }
 0x1b0   : > { %1319 = dma.done.wait (%p1637_p11), [#allocation5], 128  }
 0x1b1   : > { %1321 = vsyncadd (%p1637_p11), [#allocation5], 4294967168 }
 0x1b2 PF: > { %s22_s20 = sadd.s32 1, %s1344_s20   ;;  %s1697_s15 = smov %s1328_s16 }
 0x1b3   : > { %p19_p10 = scmp.ge.s32.totalorder %s22_s20, 4   ;;  %s1698_s16 = smov %s1332_s17 }
 0x1b4   : > { %s1699_s17 = smov %s1477_s9  ;;  %s1700_s18 = smov %s1340_s19 }
 0x1b5   : > { %s1701_s19 = smov %s1703_s26  ;;  %21 = sbr.rel (!%p19_p10) target bundleno = 8 (0x8), region = 100 }
 0x1bc   :  { %821 = vsyncpa [#allocation4], 1 }
 0x1bd   :  { %823 = vsyncpa [#allocation4 + $0x1], 1 }
 0x1be   :  { %824 = vsyncpa [#allocation9], 1 }
 0x1bf   :  { %826 = vsyncpa [#allocation9 + $0x1], 1 }
 0x1c0   :  { %827 = vsyncpa [#allocation5], 1 }
 0x1c1   :  { %829 = vsyncpa [#allocation5 + $0x1], 1 }
 0x1c2   :  { %830 = vsyncpa [#allocation6], 1 }
 0x1c3   :  { %832 = vsyncpa [#allocation6 + $0x1], 1 }

</bundles_post_ra>
